<compile_context>
chip_gen: v6e
topology: v6e:2x2x1
jax: 0.10.0
libtpu: 0.0.40
codegen_flags: <defaults>
</compile_context>

<pallas_src>
import functools

import jax
import jax.numpy as jnp
from jax.experimental import pallas as pl
from jax.experimental.pallas import tpu as pltpu


def _round_up(v, m):
    return ((v + m - 1) // m) * m


def _padded_tile_bytes(shape, dtype):
    """VMEM footprint of one buffer of a block (last two dims padded to (8, 128))."""
    shape = tuple(shape)
    lead = 1
    for d in shape[:-2]:
        lead *= int(d)
    sub = _round_up(int(shape[-2]), 8) if len(shape) >= 2 else 1
    lane = _round_up(int(shape[-1]), 128)
    return lead * sub * lane * jnp.dtype(dtype).itemsize


def _vmem_capacity_bytes():
    """Physical VMEM of this chip generation (v5e/v6e: 128 MiB, v7x: 64 MiB)."""
    try:
        info = pltpu.get_tpu_info()
        for field in ("vmem_capacity_bytes", "vmem_size_bytes"):
            cap = getattr(info, field, None)
            if cap:
                return int(cap)
    except Exception:
        pass
    return 64 << 20  # unknown chip: assume the smallest so we never oversubscribe


def _excitation_gate(pooled, w1_ref, b1_ref, w2_ref, b2_ref, use_mxu):
    """pooled: (C, 1) f32 channel means -> sigmoid gate (C, 1) f32."""
    b1 = b1_ref[...].astype(jnp.float32)
    b2 = b2_ref[...].astype(jnp.float32)
    if use_mxu:
        # bf16 weights stay bf16 in VMEM (half the DMA); MXU accumulates in f32.
        s = jnp.dot(w1_ref[...], pooled.astype(w1_ref.dtype),
                    preferred_element_type=jnp.float32) + b1           # (C_se, 1)
        s = jnp.maximum(s, 0.0)
        g = jnp.dot(w2_ref[...], s.astype(w2_ref.dtype),
                    preferred_element_type=jnp.float32) + b2           # (C, 1)
    else:
        # Exact-f32 VPU path (f32 weights / tiny channel counts).
        w1 = w1_ref[...].astype(jnp.float32)                           # (C, C_se)
        w2 = w2_ref[...].astype(jnp.float32)                           # (C, C_se)
        s = jnp.sum(w1 * pooled, axis=0, keepdims=True) + b1           # (1, C_se)
        s = jnp.maximum(s, 0.0)
        g = jnp.sum(w2 * s, axis=1, keepdims=True) + b2                # (C, 1)
    return jax.nn.sigmoid(g)


# --------------------------- streaming path (HW >= 128) ---------------------------

def _se_kernel(x_ref, w1_ref, b1_ref, w2_ref, b2_ref, o_ref, acc_ref, *,
               hw, tile_hw, use_mxu, scale_in_io_dtype):
    # x/o blocks: (1, C, tile_hw); acc_ref: (C, 1) f32 (pool-sum, later the gate).
    p = pl.program_id(1)        # phase: 0 = pool (+ excite on last tile), 1 = scale
    t = pl.program_id(2)        # spatial tile
    nt = pl.num_programs(2)
    ragged = (hw % tile_hw) != 0    # static

    @pl.when((p == 0) & (t == 0))
    def _init():
        acc_ref[...] = jnp.zeros_like(acc_ref)

    def _accumulate(masked):
        x = x_ref[0].astype(jnp.float32)                       # (C, tile_hw)
        if masked:
            lane = jax.lax.broadcasted_iota(jnp.int32, x.shape, 1) + t * tile_hw
            x = jnp.where(lane < hw, x, 0.0)
        acc_ref[...] += jnp.sum(x, axis=1, keepdims=True)      # (C, 1)

    if ragged:
        # Steady-state tiles run the unmasked path; only the final partial tile
        # pays for the iota/compare/select.
        @pl.when((p == 0) & (t < nt - 1))
        def _pool_full():
            _accumulate(False)

        @pl.when((p == 0) & (t == nt - 1))
        def _pool_tail():
            _accumulate(True)
    else:
        @pl.when(p == 0)
        def _pool():
            _accumulate(False)

    @pl.when((p == 0) & (t == nt - 1))
    def _excite():
        pooled = acc_ref[...] * (1.0 / hw)                     # true-HW mean
        acc_ref[...] = _excitation_gate(pooled, w1_ref, b1_ref, w2_ref, b2_ref,
                                        use_mxu)               # gate, (C, 1)

    @pl.when(p == 1)
    def _scale():
        if scale_in_io_dtype:
            # bf16 I/O: gate applied in bf16 (no f32 upcast of the whole tile).
            o_ref[...] = (x_ref[0] * acc_ref[...].astype(o_ref.dtype))[None]
        else:
            y = x_ref[0].astype(jnp.float32) * acc_ref[...]
            o_ref[...] = y[None].astype(o_ref.dtype)


# ----------------------- small-HW path (channels folded into lanes) -----------------------

def _se_fold_kernel(x_ref, w1_ref, b1_ref, w2_ref, b2_ref, o_ref, *, hw, k):
    # x block: (1, R, k*hw). Channel c = r*k + j occupies lanes [j*hw, (j+1)*hw) of row r.
    x = x_ref[0].astype(jnp.float32)                           # (R, L)
    r_dim = x.shape[0]
    lane = jax.lax.broadcasted_iota(jnp.int32, x.shape, 1)     # (R, L)
    col = jax.lax.broadcasted_iota(jnp.int32, (r_dim, k), 1)   # (R, k)

    # Squeeze: per-channel means kept in the folded (R, k) layout (no relayouts).
    pooled_rk = jnp.zeros((r_dim, k), jnp.float32)
    for j in range(k):                                         # k is small & static
        in_seg = (lane >= j * hw) & (lane < (j + 1) * hw)
        seg_sum = jnp.sum(jnp.where(in_seg, x, 0.0), axis=1, keepdims=True)   # (R, 1)
        pooled_rk = pooled_rk + jnp.where(col == j, seg_sum, 0.0)
    pooled_rk = pooled_rk * (1.0 / hw)

    # Excitation (tiny, runs once per image): exact-f32 VPU broadcast+reduce with
    # weights pre-arranged by the wrapper in the folded (R, k, C_se) layout.
    w1 = w1_ref[...].astype(jnp.float32)                       # (R, k, C_se)
    b1 = b1_ref[...].astype(jnp.float32)                       # (1, C_se)
    w2 = w2_ref[...].astype(jnp.float32)                       # (R, k, C_se)
    b2 = b2_ref[...].astype(jnp.float32)                       # (R, k)
    s = jnp.sum(w1 * pooled_rk[:, :, None], axis=0)            # (k, C_se)
    s = jnp.sum(s, axis=0, keepdims=True) + b1                 # (1, C_se)
    s = jnp.maximum(s, 0.0)
    g = jnp.sum(w2 * s[None, :, :], axis=2) + b2               # (R, k)
    gate_rk = jax.nn.sigmoid(g)

    # Scale: broadcast each channel's gate across its hw lanes, multiply once.
    gate_full = jnp.zeros_like(x)
    for j in range(k):
        in_seg = (lane >= j * hw) & (lane < (j + 1) * hw)
        gate_full = jnp.where(in_seg, gate_rk[:, j:j + 1], gate_full)
    o_ref[...] = (x * gate_full)[None].astype(o_ref.dtype)


# --------------------------------- wrapper ---------------------------------

def se_forward(x_nchw, w1, b1, w2, b2, *, tile_hw=None, stream_budget_bytes=None,
               fold_small_hw=True):
    """SE block. x_nchw: (N, C, H, W) float (f32/bf16). Weights keep the PyTorch
    1x1-conv shapes: w1 (C_se, C[,1,1]), b1 (C_se,), w2 (C, C_se[,1,1]), b2 (C,).
    Output has the same dtype/layout as x."""
    n, c, h, w_sp = x_nchw.shape
    w1 = jnp.asarray(w1); b1 = jnp.asarray(b1)
    w2 = jnp.asarray(w2); b2 = jnp.asarray(b2)
    c_se = w1.shape[0]
    hw = h * w_sp
    dtype = x_nchw.dtype
    itemsize = jnp.dtype(dtype).itemsize

    vmem_cap = _vmem_capacity_bytes()
    vmem_cap_limit = int(0.75 * vmem_cap)   # never oversubscribe physical VMEM (v7x: 48 MiB)

    w1_2d = w1.reshape(c_se, c)
    w2_2d = w2.reshape(c, c_se)

    # ---- small-HW path: fold channels into the lane axis for lane-dense DMA/stores ----
    fold_k = 0
    if fold_small_hw and tile_hw is None and hw < 128:
        for k in range(1, min(c, 32) + 1):
            if c % k == 0 and k * hw >= 128:
                fold_k = k
                break

    if fold_k:
        r_dim = c // fold_k
        l_dim = fold_k * hw
        x_fold = x_nchw.reshape(n, r_dim, l_dim)               # free row-major view
        w1_f = w1_2d.T.reshape(r_dim, fold_k, c_se)            # channel axis -> (R, k)
        b1_f = b1.reshape(1, c_se)
        w2_f = w2_2d.reshape(r_dim, fold_k, c_se)
        b2_f = b2.reshape(r_dim, fold_k)

        params = (_padded_tile_bytes(w1_f.shape, w1_f.dtype)
                  + _padded_tile_bytes(b1_f.shape, b1_f.dtype)
                  + _padded_tile_bytes(w2_f.shape, w2_f.dtype)
                  + _padded_tile_bytes(b2_f.shape, b2_f.dtype))
        need = 4 * _padded_tile_bytes((r_dim, l_dim), dtype) + 2 * params + (8 << 20)
        vmem_limit = max(16 << 20, min(int(need), vmem_cap_limit))

        kernel = functools.partial(_se_fold_kernel, hw=hw, k=fold_k)
        out = pl.pallas_call(
            kernel,
            out_shape=jax.ShapeDtypeStruct((n, r_dim, l_dim), dtype),
            grid_spec=pltpu.PrefetchScalarGridSpec(
                num_scalar_prefetch=0,
                grid=(n,),
                in_specs=[
                    pl.BlockSpec((1, r_dim, l_dim), lambda i: (i, 0, 0)),
                    pl.BlockSpec(w1_f.shape, lambda i: (0, 0, 0)),
                    pl.BlockSpec(b1_f.shape, lambda i: (0, 0)),
                    pl.BlockSpec(w2_f.shape, lambda i: (0, 0, 0)),
                    pl.BlockSpec(b2_f.shape, lambda i: (0, 0)),
                ],
                out_specs=pl.BlockSpec((1, r_dim, l_dim), lambda i: (i, 0, 0)),
            ),
            compiler_params=pltpu.CompilerParams(
                dimension_semantics=("parallel",),
                vmem_limit_bytes=vmem_limit,
            ),
        )(x_fold, w1_f, b1_f, w2_f, b2_f)
        return out.reshape(n, c, h, w_sp)

    # ---- general path: two-phase streaming over lane-dense spatial tiles ----
    x = x_nchw.reshape(n, c, hw)                               # free view, no transpose

    # MXU excitation only when the weights are already low precision (bf16) and the
    # channel widths are MXU-worthy; otherwise exact-f32 VPU mat-vecs (negligible cost,
    # and avoids the slow / lossy fp32 MXU path).
    use_mxu = (w1.dtype == jnp.bfloat16 and c >= 64 and c_se >= 8
               and c % 8 == 0 and c_se % 8 == 0)
    if use_mxu:
        w1_m, b1_m = w1_2d, b1.reshape(c_se, 1)                # (C_se, C), (C_se, 1)
    else:
        w1_m, b1_m = w1_2d.T, b1.reshape(1, c_se)              # (C, C_se), (1, C_se)
    w2_m = w2_2d                                               # (C, C_se)
    b2_m = b2.reshape(c, 1)

    # Generation-aware streaming budget: ~45 MiB on v5e/v6e (128 MiB VMEM), ~22 MiB on
    # v7x (64 MiB) -> more layers stay single-pass (2 HBM passes instead of 3).
    if stream_budget_bytes is None:
        stream_budget_bytes = min(int(0.35 * vmem_cap), 56 << 20)

    if tile_hw is None:
        max_tile = stream_budget_bytes // (4 * c * itemsize)   # 2 in + 2 out buffers
        tile_hw = hw if hw <= max_tile else max(128, (max_tile // 128) * 128)
    if tile_hw >= hw:
        tile_hw = hw
    else:
        tile_hw = max(128, (tile_hw // 128) * 128)             # keep tiles lane-dense
    num_tiles = pl.cdiv(hw, tile_hw)

    # Many small tiles expose per-step overhead / DMA latency: buffer x 3-deep.
    deep_buffer = num_tiles >= 3 and c * tile_hw * itemsize <= (4 << 20)
    x_bufs = 3 if deep_buffer else 2

    param_bytes = 2 * (_padded_tile_bytes(w1_m.shape, w1_m.dtype)
                       + _padded_tile_bytes(b1_m.shape, b1_m.dtype)
                       + _padded_tile_bytes(w2_m.shape, w2_m.dtype)
                       + _padded_tile_bytes(b2_m.shape, b2_m.dtype))
    stream_bytes = (x_bufs + 2) * _padded_tile_bytes((c, tile_hw), dtype)
    scratch_bytes = _padded_tile_bytes((c, 1), jnp.float32)
    need = stream_bytes + param_bytes + scratch_bytes + (8 << 20)
    vmem_limit = max(24 << 20, min(int(need), vmem_cap_limit))

    x_map = lambda i, p, t: (i, 0, t)
    if deep_buffer:
        try:
            x_spec = pl.BlockSpec((1, c, tile_hw), x_map, pipeline_mode=pl.Buffered(3))
        except (TypeError, AttributeError, ValueError):
            x_spec = pl.BlockSpec((1, c, tile_hw), x_map)
    else:
        x_spec = pl.BlockSpec((1, c, tile_hw), x_map)

    kernel = functools.partial(
        _se_kernel, hw=hw, tile_hw=tile_hw, use_mxu=use_mxu,
        scale_in_io_dtype=(dtype == jnp.bfloat16))

    out = pl.pallas_call(
        kernel,
        out_shape=jax.ShapeDtypeStruct((n, c, hw), dtype),
        grid_spec=pltpu.PrefetchScalarGridSpec(
            num_scalar_prefetch=0,
            grid=(n, 2, num_tiles),
            in_specs=[
                x_spec,
                pl.BlockSpec(w1_m.shape, lambda i, p, t: (0, 0)),
                pl.BlockSpec(b1_m.shape, lambda i, p, t: (0, 0)),
                pl.BlockSpec(w2_m.shape, lambda i, p, t: (0, 0)),
                pl.BlockSpec(b2_m.shape, lambda i, p, t: (0, 0)),
            ],
            # p*t pins the output block to tile 0 during the pooling phase, so nothing
            # is written back to HBM until phase 1 rewrites it (the block index does
            # not change between phase 0 and phase-1/t=0, so the unwritten block is
            # never flushed). Ragged final tiles rely on Pallas clipping the writeback.
            out_specs=pl.BlockSpec((1, c, tile_hw), lambda i, p, t: (i, 0, p * t)),
            scratch_shapes=[pltpu.VMEM((c, 1), jnp.float32)],
        ),
        compiler_params=pltpu.CompilerParams(
            dimension_semantics=("parallel", "arbitrary", "arbitrary"),
            vmem_limit_bytes=vmem_limit,
        ),
    )(x, w1_m, b1_m, w2_m, b2_m)

    return out.reshape(n, c, h, w_sp)


def se_reference(x, w1, b1, w2, b2):
    """Pure-JAX reference mirroring the PyTorch forward (f32 math, exact dots)."""
    xf = x.astype(jnp.float32)
    c_se, c = w1.shape[0], w2.shape[0]
    w1f = jnp.asarray(w1, jnp.float32).reshape(c_se, c)
    w2f = jnp.asarray(w2, jnp.float32).reshape(c, c_se)
    b1f = jnp.asarray(b1, jnp.float32).reshape(c_se)
    b2f = jnp.asarray(b2, jnp.float32).reshape(c)
    pooled = jnp.mean(xf, axis=(2, 3))                                    # (N, C)
    s = jnp.maximum(jnp.dot(pooled, w1f.T, precision=jax.lax.Precision.HIGHEST) + b1f, 0.0)
    g = jax.nn.sigmoid(jnp.dot(s, w2f.T, precision=jax.lax.Precision.HIGHEST) + b2f)
    return xf * g[:, :, None, None]


if __name__ == "__main__":
    root = jax.random.PRNGKey(0)

    def run_case(seed, name, *, n, c, c_se, h, w, x_dtype=jnp.float32,
                 w_dtype=jnp.float32, tile_hw=None, atol=1e-5, rtol=1e-5):
        key = jax.random.fold_in(root, seed)
        kx, k1, k2, k3, k4 = jax.random.split(key, 5)
        x = jax.random.normal(kx, (n, c, h, w), jnp.float32).astype(x_dtype)
        # Conv2d(w_in, w_se, 1, bias=True): weight (w_se, w_in); and vice versa.
        w1 = (jax.random.normal(k1, (c_se, c), jnp.float32) * 0.5).astype(w_dtype)
        b1 = (jax.random.normal(k2, (c_se,), jnp.float32) * 0.1).astype(w_dtype)
        w2 = (jax.random.normal(k3, (c, c_se), jnp.float32) * 0.5).astype(w_dtype)
        b2 = (jax.random.normal(k4, (c,), jnp.float32) * 0.1).astype(w_dtype)

        out = jax.block_until_ready(se_forward(x, w1, b1, w2, b2, tile_hw=tile_hw))
        assert out.shape == x.shape and out.dtype == x.dtype, name
        ref = se_reference(x, w1, b1, w2, b2)
        err = float(jnp.max(jnp.abs(out.astype(jnp.float32) - ref)))
        ok = bool(jnp.allclose(out.astype(jnp.float32), ref, atol=atol, rtol=rtol))
        assert ok, f"{name}: max abs err {err}"

    # Spec-sized case (2, 4, 16, 16) plus cases exercising every kernel variant.
    run_case(0, "single-tile f32",            n=2, c=4,  c_se=2,  h=16, w=16)
    run_case(1, "two-phase 128-lane tiles",   n=2, c=4,  c_se=2,  h=16, w=16, tile_hw=128)
    run_case(2, "ragged last tile",           n=2, c=4,  c_se=2,  h=12, w=12, tile_hw=128)
    run_case(3, "bf16 I/O",                   n=2, c=4,  c_se=2,  h=16, w=16,
             x_dtype=jnp.bfloat16, atol=5e-2, rtol=5e-2)
    run_case(4, "small-HW channel fold",      n=2, c=4,  c_se=2,  h=8,  w=8)
    run_case(5, "fold with ragged lanes",     n=2, c=8,  c_se=4,  h=7,  w=7)
    run_case(6, "wide-C f32 (VPU excitation)", n=2, c=64, c_se=16, h=16, w=16)
    run_case(7, "MXU excitation (bf16 weights)", n=2, c=64, c_se=16, h=16, w=16,
             x_dtype=jnp.bfloat16, w_dtype=jnp.bfloat16, atol=5e-2, rtol=5e-2)
    run_case(8, "fold + bf16 weights/io",     n=2, c=64, c_se=16, h=8,  w=8,
             x_dtype=jnp.bfloat16, w_dtype=jnp.bfloat16, atol=5e-2, rtol=5e-2)
    run_case(9, "deep-buffer streaming",      n=2, c=4,  c_se=2,  h=32, w=32, tile_hw=128)

    print("KERNEL_OK")
</pallas_src>

<mosaic_0001>
module attributes {stable_mosaic.version = 11 : i64} {
  func.func @_se_kernel(%arg0: i32, %arg1: i32, %arg2: i32, %arg3: memref<1x4x256xf32, #tpu.memory_space<vmem>>, %arg4: memref<4x2xf32, #tpu.memory_space<vmem>>, %arg5: memref<1x2xf32, #tpu.memory_space<vmem>>, %arg6: memref<4x2xf32, #tpu.memory_space<vmem>>, %arg7: memref<4x1xf32, #tpu.memory_space<vmem>>, %arg8: memref<1x4x256xf32, #tpu.memory_space<vmem>>, %arg9: memref<4x1xf32, #tpu.memory_space<vmem>>) attributes {dimension_semantics = [#tpu.dimension_semantics<parallel>, #tpu.dimension_semantics<arbitrary>, #tpu.dimension_semantics<arbitrary>], iteration_bounds = array<i64: 2, 2, 1>, scalar_prefetch = 0 : i64, scratch_operands = 1 : i64, tpu.core_type = #tpu.core_type<tc>, window_params = [{transform_indices = @transform_0, window_bounds = array<i64: 1, 4, 256>}, {pipeline_mode = #tpu.pipeline_mode<synchronous>, transform_indices = @transform_1, window_bounds = array<i64: 4, 2>}, {pipeline_mode = #tpu.pipeline_mode<synchronous>, transform_indices = @transform_2, window_bounds = array<i64: 1, 2>}, {pipeline_mode = #tpu.pipeline_mode<synchronous>, transform_indices = @transform_3, window_bounds = array<i64: 4, 2>}, {pipeline_mode = #tpu.pipeline_mode<synchronous>, transform_indices = @transform_4, window_bounds = array<i64: 4, 1>}, {transform_indices = @transform_5, window_bounds = array<i64: 1, 4, 256>}]} {
    %c0_i32 = arith.constant 0 : i32
    %0 = arith.cmpi eq, %arg1, %c0_i32 : i32
    %c0_i32_0 = arith.constant 0 : i32
    %1 = arith.cmpi eq, %arg2, %c0_i32_0 : i32
    %2 = arith.andi %0, %1 : i1
    %3 = arith.extui %2 : i1 to i32
    %c0_i32_1 = arith.constant 0 : i32
    %4 = arith.cmpi ne, %3, %c0_i32_1 : i32
    scf.if %4 {
      %cst = arith.constant 0.000000e+00 : f32
      %16 = vector.broadcast %cst : f32 to vector<4x1xf32>
      %c0 = arith.constant 0 : index
      %c0_8 = arith.constant 0 : index
      %17 = vector.load %arg9[%c0, %c0_8] : memref<4x1xf32, #tpu.memory_space<vmem>>, vector<4x1xf32>
      tpu.vector_store %arg9[%c0, %c0_8], %16 {strides = array<i32>} : memref<4x1xf32, #tpu.memory_space<vmem>>, vector<4x1xf32>,
    } else {
    }
    %c0_i32_2 = arith.constant 0 : i32
    %5 = arith.cmpi eq, %arg1, %c0_i32_2 : i32
    %6 = arith.extui %5 : i1 to i32
    %c0_i32_3 = arith.constant 0 : i32
    %7 = arith.cmpi ne, %6, %c0_i32_3 : i32
    scf.if %7 {
      %c0 = arith.constant 0 : index
      %c0_8 = arith.constant 0 : index
      %c0_9 = arith.constant 0 : index
      %16 = vector.load %arg3[%c0, %c0_8, %c0_9] : memref<1x4x256xf32, #tpu.memory_space<vmem>>, vector<1x4x256xf32>
      %17 = vector.shape_cast %16 : vector<1x4x256xf32> to vector<4x256xf32>
      %c0_10 = arith.constant 0 : index
      %c0_11 = arith.constant 0 : index
      %18 = vector.load %arg9[%c0_10, %c0_11] : memref<4x1xf32, #tpu.memory_space<vmem>>, vector<4x1xf32>
      %cst = arith.constant dense<0.000000e+00> : vector<4xf32>
      %19 = vector.multi_reduction <add>, %17, %cst [1] : vector<4x256xf32> to vector<4xf32>
      %20 = vector.shape_cast %19 : vector<4xf32> to vector<4x1xf32>
      %21 = arith.addf %18, %20 : vector<4x1xf32>
      %c0_12 = arith.constant 0 : index
      %c0_13 = arith.constant 0 : index
      %22 = vector.load %arg9[%c0_12, %c0_13] : memref<4x1xf32, #tpu.memory_space<vmem>>, vector<4x1xf32>
      tpu.vector_store %arg9[%c0_12, %c0_13], %21 {strides = array<i32>} : memref<4x1xf32, #tpu.memory_space<vmem>>, vector<4x1xf32>,
    } else {
    }
    %c0_i32_4 = arith.constant 0 : i32
    %8 = arith.cmpi eq, %arg1, %c0_i32_4 : i32
    %c0_i32_5 = arith.constant 0 : i32
    %9 = arith.cmpi eq, %arg2, %c0_i32_5 : i32
    %10 = arith.andi %8, %9 : i1
    %11 = arith.extui %10 : i1 to i32
    %c0_i32_6 = arith.constant 0 : i32
    %12 = arith.cmpi ne, %11, %c0_i32_6 : i32
    scf.if %12 {
      %c0 = arith.constant 0 : index
      %c0_8 = arith.constant 0 : index
      %16 = vector.load %arg9[%c0, %c0_8] : memref<4x1xf32, #tpu.memory_space<vmem>>, vector<4x1xf32>
      %cst = arith.constant 3.906250e-03 : f32
      %17 = vector.broadcast %cst : f32 to vector<4x1xf32>
      %18 = arith.mulf %16, %17 : vector<4x1xf32>
      %c0_9 = arith.constant 0 : index
      %c0_10 = arith.constant 0 : index
      %19 = vector.load %arg5[%c0_9, %c0_10] : memref<1x2xf32, #tpu.memory_space<vmem>>, vector<1x2xf32>
      %c0_11 = arith.constant 0 : index
      %c0_12 = arith.constant 0 : index
      %20 = vector.load %arg7[%c0_11, %c0_12] : memref<4x1xf32, #tpu.memory_space<vmem>>, vector<4x1xf32>
      %c0_13 = arith.constant 0 : index
      %c0_14 = arith.constant 0 : index
      %21 = vector.load %arg4[%c0_13, %c0_14] : memref<4x2xf32, #tpu.memory_space<vmem>>, vector<4x2xf32>
      %c0_15 = arith.constant 0 : index
      %c0_16 = arith.constant 0 : index
      %22 = vector.load %arg6[%c0_15, %c0_16] : memref<4x2xf32, #tpu.memory_space<vmem>>, vector<4x2xf32>
      %23 = vector.broadcast %18 : vector<4x1xf32> to vector<4x2xf32>
      %24 = arith.mulf %21, %23 : vector<4x2xf32>
      %cst_17 = arith.constant dense<0.000000e+00> : vector<2xf32>
      %25 = vector.multi_reduction <add>, %24, %cst_17 [0] : vector<4x2xf32> to vector<2xf32>
      %26 = vector.shape_cast %25 : vector<2xf32> to vector<1x2xf32>
      %27 = arith.addf %26, %19 : vector<1x2xf32>
      %cst_18 = arith.constant 0.000000e+00 : f32
      %28 = vector.broadcast %cst_18 : f32 to vector<1x2xf32>
      %29 = arith.maximumf %27, %28 : vector<1x2xf32>
      %30 = vector.broadcast %29 : vector<1x2xf32> to vector<4x2xf32>
      %31 = arith.mulf %22, %30 : vector<4x2xf32>
      %cst_19 = arith.constant dense<0.000000e+00> : vector<4xf32>
      %32 = vector.multi_reduction <add>, %31, %cst_19 [1] : vector<4x2xf32> to vector<4xf32>
      %33 = vector.shape_cast %32 : vector<4xf32> to vector<4x1xf32>
      %34 = arith.addf %33, %20 : vector<4x1xf32>
      %35 = arith.negf %34 : vector<4x1xf32>
      %36 = math.exp %35 : vector<4x1xf32>
      %cst_20 = arith.constant 1.000000e+00 : f32
      %37 = vector.broadcast %cst_20 : f32 to vector<4x1xf32>
      %38 = arith.addf %37, %36 : vector<4x1xf32>
      %39 = arith.divf %37, %38 : vector<4x1xf32>
      %c0_21 = arith.constant 0 : index
      %c0_22 = arith.constant 0 : index
      %40 = vector.load %arg9[%c0_21, %c0_22] : memref<4x1xf32, #tpu.memory_space<vmem>>, vector<4x1xf32>
      tpu.vector_store %arg9[%c0_21, %c0_22], %39 {strides = array<i32>} : memref<4x1xf32, #tpu.memory_space<vmem>>, vector<4x1xf32>,
    } else {
    }
    %c1_i32 = arith.constant 1 : i32
    %13 = arith.cmpi eq, %arg1, %c1_i32 : i32
    %14 = arith.extui %13 : i1 to i32
    %c0_i32_7 = arith.constant 0 : i32
    %15 = arith.cmpi ne, %14, %c0_i32_7 : i32
    scf.if %15 {
      %c0 = arith.constant 0 : index
      %c0_8 = arith.constant 0 : index
      %c0_9 = arith.constant 0 : index
      %16 = vector.load %arg3[%c0, %c0_8, %c0_9] : memref<1x4x256xf32, #tpu.memory_space<vmem>>, vector<1x4x256xf32>
      %17 = vector.shape_cast %16 : vector<1x4x256xf32> to vector<4x256xf32>
      %c0_10 = arith.constant 0 : index
      %c0_11 = arith.constant 0 : index
      %18 = vector.load %arg9[%c0_10, %c0_11] : memref<4x1xf32, #tpu.memory_space<vmem>>, vector<4x1xf32>
      %19 = vector.broadcast %18 : vector<4x1xf32> to vector<4x256xf32>
      %20 = arith.mulf %17, %19 : vector<4x256xf32>
      %21 = vector.shape_cast %20 : vector<4x256xf32> to vector<1x4x256xf32>
      %c0_12 = arith.constant 0 : index
      %c0_13 = arith.constant 0 : index
      %c0_14 = arith.constant 0 : index
      %22 = vector.load %arg8[%c0_12, %c0_13, %c0_14] : memref<1x4x256xf32, #tpu.memory_space<vmem>>, vector<1x4x256xf32>
      tpu.vector_store %arg8[%c0_12, %c0_13, %c0_14], %21 {strides = array<i32>} : memref<1x4x256xf32, #tpu.memory_space<vmem>>, vector<1x4x256xf32>,
    } else {
    }
    return
  }
  func.func @transform_0(%arg0: i32, %arg1: i32, %arg2: i32) -> (i32, i32, i32) {
    %c0_i32 = arith.constant 0 : i32
    %c0_i32_0 = arith.constant 0 : i32
    return %arg0, %c0_i32, %arg2 : i32, i32, i32
  }
  func.func @transform_1(%arg0: i32, %arg1: i32, %arg2: i32) -> (i32, i32) {
    %c0_i32 = arith.constant 0 : i32
    %c0_i32_0 = arith.constant 0 : i32
    %c0_i32_1 = arith.constant 0 : i32
    return %c0_i32, %c0_i32_0 : i32, i32
  }
  func.func @transform_2(%arg0: i32, %arg1: i32, %arg2: i32) -> (i32, i32) {
    %c0_i32 = arith.constant 0 : i32
    %c0_i32_0 = arith.constant 0 : i32
    %c0_i32_1 = arith.constant 0 : i32
    return %c0_i32, %c0_i32_0 : i32, i32
  }
  func.func @transform_3(%arg0: i32, %arg1: i32, %arg2: i32) -> (i32, i32) {
    %c0_i32 = arith.constant 0 : i32
    %c0_i32_0 = arith.constant 0 : i32
    %c0_i32_1 = arith.constant 0 : i32
    return %c0_i32, %c0_i32_0 : i32, i32
  }
  func.func @transform_4(%arg0: i32, %arg1: i32, %arg2: i32) -> (i32, i32) {
    %c0_i32 = arith.constant 0 : i32
    %c0_i32_0 = arith.constant 0 : i32
    %c0_i32_1 = arith.constant 0 : i32
    return %c0_i32, %c0_i32_0 : i32, i32
  }
  func.func @transform_5(%arg0: i32, %arg1: i32, %arg2: i32) -> (i32, i32, i32) {
    %0 = arith.muli %arg1, %arg2 : i32
    %c0_i32 = arith.constant 0 : i32
    %c0_i32_0 = arith.constant 0 : i32
    return %arg0, %c0_i32, %0 : i32, i32, i32
  }
}

</mosaic_0001>

<bundles_post_ra>
// kernel: tpu_custom_call.1
= control target key start
LH: loop header
LB: loop body
LE: loop exit
PB: predicated region body
PF: predicated region fallthrough
CT: control target
= control target key end

     0   :  { %10 = vsyncpa [#allocation4], 0  ;;  %s836_s0 = inlined_call_operand.vmem [shape: f32[2,4,256], index: 0, kind: input, shape index: {}]   ;;  %s837_s1 = inlined_call_operand.vmem [shape: f32[4,2], index: 1, kind: input, shape index: {}]   ;;  %s838_s2 = inlined_call_operand.vmem [shape: f32[1,2], index: 2, kind: input, shape index: {}]   ;;  %s839_s3 = inlined_call_operand.vmem [shape: f32[4,2], index: 3, kind: input, shape index: {}]   ;;  %s840_s4 = inlined_call_operand.vmem [shape: f32[4,1], index: 4, kind: input, shape index: {}]   ;;  %s841_s5 = inlined_call_operand.hbm [shape: f32[2,4,256], index: 5, kind: output, shape index: {}]  }
   0x1   :  { %12 = vsyncpa [#allocation4 + $0x1], 0  ;;  %s681_s18 = smov 0   ;;  %s683_s19 = smov 0  }
   0x2   :  { %s685_s20 = smov 0   ;;  %s687_s21 = smov 0  }
   0x3   :  { %s689_s22 = smov 0   ;;  %s691_s23 = smov 0  }
   0x4   :  { %s693_s24 = smov 0   ;;  %s695_s25 = smov 0  }
   0x5 LB: > { %s450_s26 = sadd.s32 4294967295, %s644_s25   ;;  %s451_s27 = sadd.s32 4294967294, %s644_s25   ;;  %s644_s25 = sphi %s695_s25, %s18_s25   ;;  %s640_s24 = sphi %s693_s24, %s850_s24   ;;  %s636_s23 = sphi %s691_s23, %s849_s23   ;;  %s632_s22 = sphi %s689_s22, %s848_s22   ;;  %s628_s21 = sphi %s687_s21, %s847_s21   ;;  %s624_s20 = sphi %s685_s20, %s846_s20   ;;  %s620_s19 = sphi %s683_s19, %s845_s19   ;;  %s616_s18 = sphi %s681_s18, %s844_s18  }
   0x6   : > { %s33_s28 = sadd.s32 1, %s636_s23  ;;  %s37_s29 = sadd.s32 1, %s640_s24 }
   0x7   : > { %p35_p0 = scmp.ge.s32.totalorder %s33_s28, 2  ;;  %p170_p1 = scmp.ne.s32.totalorder %s624_s20, %s620_s19 }
   0x8   : > { %p171_p2 = scmp.eq.s32.totalorder %s450_s26, 3  ;;  %p176_p4 = scmp.ne.s32.totalorder %s620_s19, %s616_s18 }
   0x9   : > { %s852_s28 = smov (%p35_p0, %s33_s28), 0  ;;  %s854_s29 = smov (!%p35_p0, %s37_s29), %s640_s24 }
   0xa   : > { %p730_p3 = por %p171_p2, %p170_p1  ;;  %p39_p5 = scmp.ge.s32.totalorder %s854_s29, 2 }
   0xb   : > { %p177_p6 = scmp.eq.s32.totalorder %s451_s27, 3  ;;  %p454_p7 = scmp.ge.s32.totalorder %s644_s25, 1 }
   0xc   : > { %p220_p8 = scmp.lt.s32.totalorder %s644_s25, 5  ;;  %s856_s29 = smov (%p39_p5, %s854_s29), 0 }
   0xd   : > { %p740_p9 = por %p177_p6, %p176_p4  ;;  %s155_s7 = ssub.s32 %s640_s24, %s856_s29 }
   0xe   : > { %p221_p10 = pnand %p454_p7, %p220_p8  ;;  %s160_s8 = sadd.s32 1, %s624_s20 }
   0xf   : > { %p158_p11 = scmp.eq.s32.totalorder %s155_s7, 0  ;;  %s249_s10 = sand.u32 (!%p221_p10), 1, %s620_s19  }
  0x10   : > { %224 = sbr.rel (%p221_p10) target bundleno = 672 (0x2a0), region = 40  ;;  %p253_p12 = scmp.lt.s32.totalorder (!%p221_p10), %s632_s22, 1 }
  0x11   : > { %s748_s9 = scalar_select %p158_p11, %s624_s20, %s160_s8  }
  0x12   : > { %s754_s11 = sshll.u32 (!%p221_p10), %s249_s10, 3  ;;  %p264_p13 = scmp.eq.s32.totalorder (!%p221_p10), %s628_s21, 0 }
  0x13   : > { %s251_s17 = scalar_lea.vmem (!%p221_p10), [#allocation3], %s754_s11 }
  0x15   : > { %s254_s12 = scalar_select %p253_p12, %s632_s22, 1  ;;  %vm270_vm0 = vcmask (%p264_p13), 3072   ;;  %v646_v0 = vmov (%p264_p13), 0.0  }
  0x16   : > { %269 = sbr.rel (!%p264_p13) target bundleno = 27 (0x1b), region = 44  ;;  %271 = vst.msk [vmem:[#allocation2] sm:$0xf] (%p264_p13), %vm270_vm0, %v646_v0 }
  0x17   : > { %s467_s13 = sshll.u32 %s254_s12, 3 }
  0x18   : > { %s761_s16 = scalar_lea.vmem %s836_s0, %s467_s13 }
  0x1b PF: > { %p459_p0 = scmp.ne.s32.totalorder %s628_s21, 0 }
  0x1d   : > { %274 = sbr.rel (%p459_p0) target bundleno = 181 (0xb5), region = 48 }
  0x22   : > { %v275_v1 = vld [vmem:[%s761_s16] sm:$0xff]  ;;  %vm280_vm1 = vcmask 1043456   ;;  %vm287_vm2 = vcmask 3072  }
  0x23   : > { %v278_v2 = vcombine.high %v275_v1, %v275_v1  ;;  %v281_v3 = vsel %vm280_vm1, %v275_v1, 0.0  ;;  %v276_v6 = vld [vmem:[#allocation2] sm:$0xf] }
  0x25   : > { %v282_v4 = vsel %vm280_vm1, %v278_v2, 0.0 }
  0x26   : > { %v283_v5 = vadd.f32 %v282_v4, %v281_v3 }
  0x28   : > { %284 = vadd.xlane.f32.xlu0 %v283_v5 }
  0xb1   : > { %v285_v7 = vpop.xlane.xlu0 %284 }
  0xb2   : > { %v286_v8 = vadd.f32 %v285_v7, %v276_v6 }
  0xb4   : > { %288 = vst.msk [vmem:[#allocation2] sm:$0xf] %vm287_vm2, %v286_v8 }
  0xb5 PF: > { %290 = sbr.rel (!%p264_p13) target bundleno = 511 (0x1ff), region = 52  ;;  %v647_v10 = vmov (%p264_p13), 0   ;;  %v295_v12 = vld [vmem:[%s837_s1] sm:$0xf] (%p264_p13)  ;;  %vm303_vm3 = vcmask (%p264_p13), 11264   ;;  %v313_v19 = vlaneseq (%p264_p13)  ;;  %vm328_vm4 = vcmask (%p264_p13), 3072  }
  0xb6   : > { %546 = vset.pattern.permute.xlu0 (%p264_p13), %v647_v10  ;;  %v293_v23 = vld [vmem:[%s838_s2] sm:$0x1] (%p264_p13) }
  0xb7   : > { %v314_v22 = vshrl.u32 (%p264_p13), %v313_v19, 7  ;;  %v296_v28 = vld [vmem:[%s839_s3] sm:$0xf] (%p264_p13) }
  0xb8   : > { %v294_v32 = vld [vmem:[%s840_s4] sm:$0xf] (%p264_p13) }
  0xb9   : > { %v315_v26 = vsub.s32 (%p264_p13), 0, %v314_v22 }
  0xbb   : > { %v291_v9 = vld [vmem:[#allocation2] sm:$0xf] }
  0xbc   : > { %v292_v11 = vmul.f32 0.00390625, %v291_v9 }
  0xbe   : > { %299 = vperm.xlu0 %546, %v292_v11  }
 0x139   : > { %v300_v13 = vpop.permute.xlu0 %299 }
 0x13a   : > { %v302_v14 = vmul.f32 %v300_v13, %v295_v12 }
 0x13c   : > { %v304_v15 = vsel %vm303_vm3, %v302_v14, 0.0 }
 0x13d   : > { %v305_v16 = vrot.slane %v304_v15, 4 }
 0x13f   : > { %v306_v17 = vadd.f32 %v305_v16, %v304_v15 }
 0x141   : > { %v307_v18 = vrot.slane %v306_v17, 2 }
 0x143   : > { %v308_v20 = vadd.f32 %v307_v18, %v306_v17 }
 0x145   : > { %v309_v21 = vrot.slane %v308_v20, 1 }
 0x147   : > { %v310_v24 = vadd.f32 %v309_v21, %v308_v20 }
 0x149   : > { %v311_v25 = vadd.f32 %v310_v24, %v293_v23 }
 0x14b   : > { %v312_v27 = vmax.f32 %v311_v25, 0.0 }
 0x14d   : > { %v316_v29 = vrot.slane %v312_v27, %v315_v26 }
 0x14f   : > { %v317_v30 = vmul.f32 %v316_v29, %v296_v28 }
 0x151   : > { %v318_v31 = vsel %vm303_vm3, %v317_v30, 0.0 }
 0x152   : > { %319 = vadd.xlane.f32.xlu0 %v318_v31 }
 0x1db   : > { %v320_v33 = vpop.xlane.xlu0 %319 }
 0x1dc   : > { %v321_v34 = vadd.f32 %v320_v33, %v294_v32 }
 0x1de   : > { %v460_v35 = vmul.f32 -1.442695, %v321_v34 }
 0x1e0   : > { %547 = vpow2.f32 %v460_v35 }
 0x1ed   : > { %v548_v36 = vpop.eup %547 }
 0x1ee   : > { %v325_v37 = vadd.f32 1.0, %v548_v36 }
 0x1f0   : > { %549 = vrcp.f32 %v325_v37 }
 0x1fd   : > { %v550_v38 = vpop.eup %549 }
 0x1fe   : > { %329 = vst.msk [vmem:[#allocation2] sm:$0xf] %vm328_vm4, %v550_v38 }
 0x1ff PF: > { %p461_p1 = scmp.ne.s32.totalorder %s628_s21, 1 }
 0x201   : > { %333 = sbr.rel (%p461_p1) target bundleno = 649 (0x289), region = 56 }
 0x206   : > { %v335_v39 = vld [vmem:[#allocation2] sm:$0xf]  ;;  %v648_v40 = vmov 0   ;;  %v649_v41 = vmov 839922192   ;;  %v343_v43 = vlaneseq }
 0x207   : > { %551 = vset.pattern.permute.xlu0 %v648_v40  ;;  %v341_v42 = vunpack.c.l.s4 %v649_v41  ;;  %v334_v48 = vld [vmem:[%s761_s16] sm:$0xff] }
 0x208   : > { %338 = vperm.xlu0 %551, %v335_v39   ;;  %v344_v45 = vshrl.u32 %v343_v43, 7 }
 0x209   : > { %v342_v44 = vunpack.c.0.s8 %v341_v42 }
 0x20b   : > { %v345_v46 = vsub.s32 %v342_v44, %v344_v45 }
 0x283   : > { %v339_v47 = vpop.permute.xlu0 %338 }
 0x284   : > { %v346_v49 = vrot.slane %v339_v47, %v345_v46 }
 0x286   : > { %v348_v50 = vmul.f32 %v346_v49, %v334_v48 }
 0x288   : > { %349 = vst [vmem:[%s251_s17] sm:$0xff] %v348_v50 }
 0x289 PF: > { %s469_s21 = sshll.u32 %s632_s22, 7  ;;  %s368_s8 = sshll.u32 %s251_s17, 4  ;;  %s369_s8 = int_to_ptr.vmem [resolvable:$true] %s368_s8 }
 0x28a   : > { %s366_s7 = scalar_lea.hbm %s841_s5, %s469_s21  ;;  %s351_s12 = scalar_lea.sflag [#allocation4], %s249_s10 }
 0x28b   : > { %s552_s16 = scalar_lea.vmem %s369_s8, 128  ;;  %s650_s13 = smov [#allocation3]  }
 0x28c   : > { %p553_p2 = scmp.ne.s32.totalorder %s369_s8, %s552_s16  ;;  %s556_s14 = sshll.u32 %s650_s13, 4  ;;  %s557_s14 = int_to_ptr.vmem [resolvable:$false] %s556_s14 }
 0x28d   : > { %s558_s15 = scalar_lea.vmem %s557_s14, 256  ;;  %p559_p6 = scmp.lt.s32.totalorder %s369_s8, %s557_s14 }
 0x28e   : > { %p554_p4 = pnand %p553_p2, %p730_p3  ;;  %p560_p7 = scmp.lt.s32.totalorder %s558_s15, %s552_s16 }
 0x290   : > { %p555_p5 = pneg %p554_p4  ;;  %p561_p8 = por %p560_p7, %p559_p6 }
 0x292   : > { %p562_p10 = pnand %p561_p8, %p555_p5 }
 0x294   : > { %565 = shalt.err (!%p562_p10)
}
 0x295   : > { %s566_s22 = scalar_lea.hbm %s366_s7, 128  ;;  %s570_s17 = scalar_lea.hbm %s841_s5, 256 }
 0x296   : > { %p567_p11 = scmp.ne.s32.totalorder %s366_s7, %s566_s22  ;;  %p571_p0 = scmp.lt.s32.totalorder %s366_s7, %s841_s5 }
 0x297   : > { %p572_p1 = scmp.lt.s32.totalorder %s570_s17, %s566_s22 }
 0x298   : > { %p568_p12 = pnand %p567_p11, %p730_p3 }
 0x299   : > { %p573_p2 = por %p572_p1, %p571_p0 }
 0x29a   : > { %p569_p13 = pneg %p568_p12 }
 0x29c   : > { %p574_p4 = pnand %p573_p2, %p569_p13 }
 0x29e   : > { %577 = shalt.err (!%p574_p4)
}
 0x29f   : > { %470 = dma.vmem_to_hbm [thread:$0]  (%p730_p3), %s369_s8, 128, %s366_s7, %s351_s12  }
 0x2a0 PF: > { %p476_p5 = scmp.ge.s32.totalorder %s644_s25, 2  ;;  %s380_s27 = sand.u32 1, %s616_s18  }
 0x2a1   : > { %s381_s16 = scalar_lea.sflag [#allocation4], %s380_s27 }
 0x2a2   : > { %p473_p6 = pnand %p476_p5, %p740_p9 }
 0x2a4   : > { %p474_p7 = pneg %p473_p6 }
 0x2a6   : > { %611 = dma.done.wait (%p474_p7), %s381_s16, 128  }
 0x2a7   : > { %613 = vsyncadd (%p474_p7), %s381_s16, 4294967168  ;;  %s18_s25 = sadd.s32 1, %s644_s25   ;;  %s844_s18 = smov %s620_s19 }
 0x2a8   : > { %p15_p8 = scmp.ge.s32.totalorder %s18_s25, 6   ;;  %s845_s19 = smov %s624_s20 }
 0x2a9   : > { %s846_s20 = smov %s748_s9  ;;  %s847_s21 = smov %s636_s23 }
 0x2aa   : > { %s848_s22 = smov %s640_s24  ;;  %s849_s23 = smov %s852_s28 }
 0x2ab   : > { %s850_s24 = smov %s856_s29  ;;  %17 = sbr.rel (!%p15_p8) target bundleno = 5 (0x5), region = 91 }
 0x2b0   :  { %386 = vsyncpa [#allocation4], 1 }
 0x2b1   :  { %388 = vsyncpa [#allocation4 + $0x1], 1 }

</bundles_post_ra>
